<compile_context>
chip_gen: v6e
topology: v6e:2x2x1
jax: 0.10.0
libtpu: 0.0.40
codegen_flags: <defaults>
</compile_context>

<pallas_src>
import math

import jax
import jax.numpy as jnp
from jax.experimental import pallas as pl
from jax.experimental.pallas import tpu as pltpu


def weighted_pool_kernel(x_ref, w_ref, mask_ref, out_ref):
    x = x_ref[...].astype(jnp.float32)      # (Bt, T, D)
    w = w_ref[...].astype(jnp.float32)      # (1, D)   lane-dense weight row
    m = mask_ref[...]                       # (Bt, T)  float32 in {0, 1}

    # alpha[b, t] = sum_d x[b, t, d] * w[d]   (VPU multiply + lane reduce)
    alpha = jnp.sum(x * w, axis=-1)                       # (Bt, T)
    # mask_logits: alpha + (1 - mask) * (-1e30)
    alpha = alpha + (1.0 - m) * (-1e30)

    # Softmax over the sequence (T) axis; normalization deferred to the end.
    a_max = jnp.max(alpha, axis=-1, keepdims=True)        # (Bt, 1)
    e = jnp.exp(alpha - a_max)                            # (Bt, T)
    denom = jnp.sum(e, axis=-1, keepdims=True)            # (Bt, 1)

    # pooled[b, d] = sum_t x[b, t, d] * e[b, t]   (VPU multiply + sublane reduce)
    pooled = jnp.sum(x * e[:, :, None], axis=1)           # (Bt, D)
    inv = pl.reciprocal(denom)                            # exact; one per row
    out_ref[...] = (pooled * inv).astype(out_ref.dtype)


def _choose_block_b(B, T, D, itemsize):
    """Pick a sublane-dense batch tile keeping the x block (double-buffered,
    plus the in-kernel f32 temporaries) well inside VMEM."""
    budget = 4 * 1024 * 1024                       # bytes per x block
    bt = budget // max(1, T * D * itemsize)
    bt = max(8, min(int(bt), 128))
    bt = (bt // 8) * 8
    # Do not pad tiny batches out to a huge tile.
    b_pad8 = ((B + 7) // 8) * 8
    bt = min(bt, max(8, b_pad8))
    return max(8, (bt // 8) * 8)


def weighted_pool(x, weight, mask, *, block_b=None):
    """x: (B, T, D), weight: (D, 1), mask: (B, T) -> pooled (B, D)."""
    B, T, D = x.shape
    itemsize = jnp.dtype(x.dtype).itemsize
    bt = block_b if block_b is not None else _choose_block_b(B, T, D, itemsize)

    # Pad batch to a multiple of the batch tile. Padded rows are fully masked
    # and x there is zero, so softmax is uniform over zeros -> pooled == 0;
    # they are sliced off at the end.
    Bp = ((B + bt - 1) // bt) * bt
    if Bp != B:
        x = jnp.pad(x, ((0, Bp - B), (0, 0), (0, 0)))
        mask = jnp.pad(mask, ((0, Bp - B), (0, 0)))

    mask2 = mask.astype(jnp.float32)               # (Bp, T), T on lanes
    w_row = weight.reshape(1, D).astype(x.dtype)   # (1, D), lane-dense

    cost = pl.CostEstimate(
        flops=4 * Bp * T * D,
        transcendentals=Bp * T,
        bytes_accessed=(Bp * T * D * itemsize      # x read
                        + Bp * T * 4               # mask read
                        + D * itemsize             # weight read
                        + Bp * D * itemsize),      # output write
    )

    out = pl.pallas_call(
        weighted_pool_kernel,
        out_shape=jax.ShapeDtypeStruct((Bp, D), x.dtype),
        grid_spec=pltpu.PrefetchScalarGridSpec(
            num_scalar_prefetch=0,
            grid=(Bp // bt,),
            in_specs=[
                pl.BlockSpec((bt, T, D), lambda i: (i, 0, 0)),  # x: Bt rows
                pl.BlockSpec((1, D), lambda i: (0, 0)),         # weight: shared
                pl.BlockSpec((bt, T), lambda i: (i, 0)),        # mask: Bt rows
            ],
            out_specs=pl.BlockSpec((bt, D), lambda i: (i, 0)),  # dense (Bt, D) slab
        ),
        compiler_params=pltpu.CompilerParams(
            dimension_semantics=("parallel",),     # megacore shard on v7x
            vmem_limit_bytes=32 * 1024 * 1024,     # safe on v5e/v6e/v7x
        ),
        cost_estimate=cost,
    )(x, w_row, mask2)
    return out[:B]


def weighted_pool_ref(x, weight, mask):
    """Pure-JAX reference mirroring the PyTorch forward."""
    alpha = jnp.einsum("btd,de->bte", x, weight)                  # (B, T, 1)
    alpha = alpha + (1.0 - mask[..., None].astype(jnp.float32)) * (-1e30)
    alphas = jax.nn.softmax(alpha, axis=1)                        # (B, T, 1)
    pooled = jnp.einsum("btd,bte->bde", x, alphas)[..., 0]        # (B, D)
    return pooled


if __name__ == "__main__":
    B, T, D = 2, 8, 32
    key = jax.random.PRNGKey(0)
    kx, kw = jax.random.split(key)

    x = jax.random.normal(kx, (B, T, D), dtype=jnp.float32)

    # Deterministic Xavier-uniform init for weight of shape (D, 1):
    # bound = sqrt(6 / (fan_in + fan_out)) = sqrt(6 / (D + 1))
    bound = math.sqrt(6.0 / (D + 1))
    weight = jax.random.uniform(kw, (D, 1), dtype=jnp.float32,
                                minval=-bound, maxval=bound)

    # Binary mask: first sequence fully valid, second valid for 5 steps.
    lengths = jnp.array([T, 5], dtype=jnp.int32)
    mask = (jnp.arange(T)[None, :] < lengths[:, None]).astype(jnp.float32)

    out = weighted_pool(x, weight, mask)
    out = jax.block_until_ready(out)

    ref = weighted_pool_ref(x, weight, mask)
    assert out.shape == (B, D)
    assert jnp.allclose(out, ref, atol=1e-5, rtol=1e-5)

    print("KERNEL_OK")
</pallas_src>

<mosaic_0001>
module attributes {stable_mosaic.version = 11 : i64} {
  func.func @weighted_pool_kernel(%arg0: i32, %arg1: memref<8x8x32xf32, #tpu.memory_space<vmem>>, %arg2: memref<1x32xf32, #tpu.memory_space<vmem>>, %arg3: memref<8x8xf32, #tpu.memory_space<vmem>>, %arg4: memref<8x32xf32, #tpu.memory_space<vmem>>) attributes {dimension_semantics = [#tpu.dimension_semantics<parallel>], iteration_bounds = array<i64: 1>, scalar_prefetch = 0 : i64, scratch_operands = 0 : i64, tpu.core_type = #tpu.core_type<tc>, window_params = [{transform_indices = @transform_0, window_bounds = array<i64: 8, 8, 32>}, {pipeline_mode = #tpu.pipeline_mode<synchronous>, transform_indices = @transform_1, window_bounds = array<i64: 1, 32>}, {transform_indices = @transform_2, window_bounds = array<i64: 8, 8>}, {transform_indices = @transform_3, window_bounds = array<i64: 8, 32>}]} {
    %c0 = arith.constant 0 : index
    %c0_0 = arith.constant 0 : index
    %c0_1 = arith.constant 0 : index
    %0 = vector.load %arg1[%c0, %c0_0, %c0_1] : memref<8x8x32xf32, #tpu.memory_space<vmem>>, vector<8x8x32xf32>
    %c0_2 = arith.constant 0 : index
    %c0_3 = arith.constant 0 : index
    %1 = vector.load %arg2[%c0_2, %c0_3] : memref<1x32xf32, #tpu.memory_space<vmem>>, vector<1x32xf32>
    %c0_4 = arith.constant 0 : index
    %c0_5 = arith.constant 0 : index
    %2 = vector.load %arg3[%c0_4, %c0_5] : memref<8x8xf32, #tpu.memory_space<vmem>>, vector<8x8xf32>
    %3 = vector.shape_cast %1 : vector<1x32xf32> to vector<1x1x32xf32>
    %4 = vector.broadcast %3 : vector<1x1x32xf32> to vector<8x8x32xf32>
    %5 = arith.mulf %0, %4 : vector<8x8x32xf32>
    %cst = arith.constant dense<0.000000e+00> : vector<8x8xf32>
    %6 = vector.multi_reduction <add>, %5, %cst [2] : vector<8x8x32xf32> to vector<8x8xf32>
    %cst_6 = arith.constant 1.000000e+00 : f32
    %7 = vector.broadcast %cst_6 : f32 to vector<8x8xf32>
    %8 = arith.subf %7, %2 : vector<8x8xf32>
    %cst_7 = arith.constant -1.000000e+30 : f32
    %9 = vector.broadcast %cst_7 : f32 to vector<8x8xf32>
    %10 = arith.mulf %8, %9 : vector<8x8xf32>
    %11 = arith.addf %6, %10 : vector<8x8xf32>
    %cst_8 = arith.constant dense<0xFF800000> : vector<8xf32>
    %12 = vector.multi_reduction <maximumf>, %11, %cst_8 [1] : vector<8x8xf32> to vector<8xf32>
    %13 = vector.shape_cast %12 : vector<8xf32> to vector<8x1xf32>
    %14 = vector.broadcast %13 : vector<8x1xf32> to vector<8x8xf32>
    %15 = arith.subf %11, %14 : vector<8x8xf32>
    %16 = math.exp %15 : vector<8x8xf32>
    %cst_9 = arith.constant dense<0.000000e+00> : vector<8xf32>
    %17 = vector.multi_reduction <add>, %16, %cst_9 [1] : vector<8x8xf32> to vector<8xf32>
    %18 = vector.shape_cast %17 : vector<8xf32> to vector<8x1xf32>
    %19 = vector.shape_cast %16 : vector<8x8xf32> to vector<8x8x1xf32>
    %20 = vector.broadcast %19 : vector<8x8x1xf32> to vector<8x8x32xf32>
    %21 = arith.mulf %0, %20 : vector<8x8x32xf32>
    %cst_10 = arith.constant dense<0.000000e+00> : vector<8x32xf32>
    %22 = vector.multi_reduction <add>, %21, %cst_10 [1] : vector<8x8x32xf32> to vector<8x32xf32>
    %23 = tpu.reciprocal %18 : vector<8x1xf32> -> vector<8x1xf32>
    %24 = vector.broadcast %23 : vector<8x1xf32> to vector<8x32xf32>
    %25 = arith.mulf %22, %24 : vector<8x32xf32>
    %c0_11 = arith.constant 0 : index
    %c0_12 = arith.constant 0 : index
    %26 = vector.load %arg4[%c0_11, %c0_12] : memref<8x32xf32, #tpu.memory_space<vmem>>, vector<8x32xf32>
    tpu.vector_store %arg4[%c0_11, %c0_12], %25 {strides = array<i32>} : memref<8x32xf32, #tpu.memory_space<vmem>>, vector<8x32xf32>,
    return
  }
  func.func @transform_0(%arg0: i32) -> (i32, i32, i32) {
    %c0_i32 = arith.constant 0 : i32
    %c0_i32_0 = arith.constant 0 : i32
    %c0_i32_1 = arith.constant 0 : i32
    return %arg0, %c0_i32, %c0_i32_0 : i32, i32, i32
  }
  func.func @transform_1(%arg0: i32) -> (i32, i32) {
    %c0_i32 = arith.constant 0 : i32
    %c0_i32_0 = arith.constant 0 : i32
    %c0_i32_1 = arith.constant 0 : i32
    return %c0_i32, %c0_i32_0 : i32, i32
  }
  func.func @transform_2(%arg0: i32) -> (i32, i32) {
    %c0_i32 = arith.constant 0 : i32
    %c0_i32_0 = arith.constant 0 : i32
    return %arg0, %c0_i32 : i32, i32
  }
  func.func @transform_3(%arg0: i32) -> (i32, i32) {
    %c0_i32 = arith.constant 0 : i32
    %c0_i32_0 = arith.constant 0 : i32
    return %arg0, %c0_i32 : i32, i32
  }
}

</mosaic_0001>

<bundles_post_ra>
// kernel: tpu_custom_call.1
= control target key start
LH: loop header
LB: loop body
LE: loop exit
PB: predicated region body
PF: predicated region fallthrough
CT: control target
= control target key end

     0   :  { %8 = vsyncpa [#allocation3], 0  ;;  %s819_s0 = inlined_call_operand.hbm [shape: f32[8,8,32], index: 0, kind: input, shape index: {}]   ;;  %s820_s1 = inlined_call_operand.vmem [shape: f32[1,32], index: 1, kind: input, shape index: {}]   ;;  %s821_s2 = inlined_call_operand.hbm [shape: f32[8,8], index: 2, kind: input, shape index: {}]   ;;  %s822_s3 = inlined_call_operand.hbm [shape: f32[8,32], index: 3, kind: output, shape index: {}]  }
   0x1   :  { %9 = vsyncpa [#allocation6], 0 }
   0x2   :  { %10 = vsyncpa [#allocation4], 0  ;;  %s620_s12 = smov [#allocation2]  }
   0x3   :  { %s16_s13 = sshll.u32 %s620_s12, 4  ;;  %s17_s13 = int_to_ptr.vmem [resolvable:$true] %s16_s13 }
   0x4   :  { %s562_s14 = scalar_lea.vmem %s17_s13, 1024  ;;  %p567_p1 = scmp.lt.s32.totalorder %s17_s13, %s17_s13 }
   0x5   :  { %p563_p0 = scmp.ne.s32.totalorder %s17_s13, %s562_s14  ;;  %p568_p2 = scmp.lt.s32.totalorder %s562_s14, %s562_s14 }
   0x7   :  { %p569_p3 = por %p568_p2, %p567_p1 }
   0x9   :  { %p570_p4 = pnand %p569_p3, %p563_p0 }
   0xb   :  { %573 = shalt.err (!%p570_p4)
}
   0xc   :  { %s621_s15 = smov 128   ;;  %s622_s16 = smov 8  }
   0xd   :  { %22 = dma.hbm_to_vmem [thread:$0]  %s819_s0, 1024, %s17_s13, [#allocation3], %s621_s15, %s621_s15, %s622_s16  }
   0xe   :  { %s623_s19 = smov [#allocation5]  }
   0xf   :  { %s31_s20 = sshll.u32 %s623_s19, 4  ;;  %s32_s20 = int_to_ptr.vmem [resolvable:$true] %s31_s20 }
  0x10   :  { %s582_s21 = scalar_lea.vmem %s32_s20, 128  ;;  %p587_p6 = scmp.lt.s32.totalorder %s32_s20, %s32_s20 }
  0x11   :  { %p583_p5 = scmp.ne.s32.totalorder %s32_s20, %s582_s21  ;;  %p588_p7 = scmp.lt.s32.totalorder %s582_s21, %s582_s21 }
  0x13   :  { %p589_p8 = por %p588_p7, %p587_p6 }
  0x15   :  { %p590_p9 = pnand %p589_p8, %p583_p5 }
  0x17   :  { %593 = shalt.err (!%p590_p9)
}
  0x18   :  { %34 = dma.hbm_to_vmem [thread:$0]  %s821_s2, 128, %s32_s20, [#allocation6]  }
  0x19   :  { %614 = dma.done.wait [#allocation3], 1024  }
  0x1a   :  { %615 = vsyncadd [#allocation3], 4294966272 }
  0x1b   :  { %616 = dma.done.wait [#allocation6], 128  }
  0x1c   :  { %617 = vsyncadd [#allocation6], 4294967168  ;;  %v93_v0 = vlaneseq  ;;  %v657_v4 = vld [vmem:[#allocation2 + $0x10] sm:$0xff]  ;;  %v527_v5 = vld [vmem:[%s820_s1] ss:$0 sm:$0xff]  ;;  %vm65_vm0 = vcmask 261120  }
  0x1d   :  { %v662_v6 = vld [vmem:[#allocation2] sm:$0xff]  ;;  %v59_v7 = vmul.f32 %v527_v5, %v657_v4  ;;  %v666_v9 = vld [vmem:[#allocation2 + $0x18] sm:$0xff]  ;;  %v668_v10 = vld [vmem:[#allocation2 + $0x8] sm:$0xff]  ;;  %v624_v36 = vmov 0   ;;  %vm231_vm1 = vcmask 1041409   ;;  %vm233_vm2 = vcmask 1042434  }
  0x1e   :  { %v652_v1 = vshrl.u32 %v93_v0, 7  ;;  %v198_v2 = vand.u32 127, %v93_v0  ;;  %v57_v8 = vmul.f32 %v527_v5, %v662_v6  ;;  %v60_v11 = vmul.f32 %v527_v5, %v666_v9  ;;  %v672_v13 = vld [vmem:[#allocation2 + $0x28] sm:$0xff]  ;;  %v674_v14 = vld [vmem:[#allocation2 + $0x20] sm:$0xff]  ;;  %v682_v21 = vld [vmem:[#allocation2 + $0x38] sm:$0xff]  ;;  %535 = vset.pattern.permute.xlu1 %v624_v36  ;;  %534 = vset.pattern.permute.xlu0 %v624_v36  ;;  %s625_s1 = smov [#allocation7]  }
  0x1f   :  { %v58_v12 = vmul.f32 %v527_v5, %v668_v10  ;;  %v72_v15 = vsel %vm65_vm0, %v59_v7, 0.0  ;;  %v62_v19 = vmul.f32 %v527_v5, %v672_v13  ;;  %v61_v20 = vmul.f32 %v527_v5, %v674_v14  ;;  %v684_v22 = vld [vmem:[#allocation2 + $0x30] sm:$0xff]  ;;  %v50_v29 = vld [vmem:[#allocation5] sm:$0xff]  ;;  %s517_s2 = sshll.u32 %s625_s1, 4  ;;  %s518_s2 = int_to_ptr.vmem [resolvable:$true] %s517_s2 }
  0x20   :  { %v655_v3 = vsub.s32 %v198_v2, %v652_v1  ;;  %v66_v16 = vsel %vm65_vm0, %v57_v8, 0.0  ;;  %73 = vadd.xlane.f32.xlu1 %v72_v15  ;;  %v75_v17 = vsel %vm65_vm0, %v60_v11, 0.0  ;;  %v64_v25 = vmul.f32 %v527_v5, %v682_v21  ;;  %s594_s25 = scalar_lea.vmem %s518_s2, 128  ;;  %p599_p11 = scmp.lt.s32.totalorder %s518_s2, %s518_s2 }
  0x21   :  { %67 = vadd.xlane.f32.xlu0 %v66_v16  ;;  %v69_v18 = vsel %vm65_vm0, %v58_v12, 0.0  ;;  %v81_v23 = vsel %vm65_vm0, %v62_v19, 0.0  ;;  %v78_v24 = vsel %vm65_vm0, %v61_v20, 0.0  ;;  %v63_v26 = vmul.f32 %v527_v5, %v684_v22  ;;  %p595_p10 = scmp.ne.s32.totalorder %s518_s2, %s594_s25  ;;  %p600_p12 = scmp.lt.s32.totalorder %s594_s25, %s594_s25 }
  0x22   :  { %v87_v27 = vsel %vm65_vm0, %v64_v25, 0.0  ;;  %v90_v30 = vsub.f32 1.0, %v50_v29  ;;  %v102_v32 = vsub.s32 1, %v652_v1  ;;  %v109_v34 = vsub.s32 2, %v652_v1 }
  0x23   :  { %v84_v28 = vsel %vm65_vm0, %v63_v26, 0.0  ;;  %v95_v35 = vsub.s32 0, %v652_v1  ;;  %v116_v38 = vsub.s32 3, %v652_v1  ;;  %v123_v40 = vsub.s32 4, %v652_v1  ;;  %p601_p13 = por %p600_p12, %p599_p11 }
  0x24   :  { %76 = vadd.xlane.f32.xlu1 %v75_v17  ;;  %v91_v31 = vmul.f32 -1e+30, %v90_v30  ;;  %v130_v42 = vsub.s32 5, %v652_v1  ;;  %v137_v44 = vsub.s32 6, %v652_v1  ;;  %v144_v46 = vsub.s32 7, %v652_v1 }
  0x25   :  { %70 = vadd.xlane.f32.xlu0 %v69_v18  ;;  %vm235_vm3 = vcmask 1043459   ;;  %vm237_vm4 = vcmask 1044484   ;;  %vm239_vm5 = vcmask 1045509   ;;  %vm241_vm6 = vcmask 1046534   ;;  %p602_p0 = pnand %p601_p13, %p595_p10 }
  0x26   :  { %v103_v33 = vrot.slane %v91_v31, %v102_v32  ;;  %v110_v37 = vrot.slane %v91_v31, %v109_v34  ;;  %v96_v39 = vrot.slane %v91_v31, %v95_v35  ;;  %v117_v41 = vrot.slane %v91_v31, %v116_v38 }
  0x27   :  { %v124_v43 = vrot.slane %v91_v31, %v123_v40  ;;  %v131_v45 = vrot.slane %v91_v31, %v130_v42  ;;  %v138_v47 = vrot.slane %v91_v31, %v137_v44  ;;  %v145_v48 = vrot.slane %v91_v31, %v144_v46 }
  0x28   :  { %82 = vadd.xlane.f32.xlu1 %v81_v23  ;;  %vm243_vm7 = vcmask 1047559   ;;  %vm246_vm8 = vcmask 64512  }
  0x29   :  { %79 = vadd.xlane.f32.xlu0 %v78_v24 }
  0x2c   :  { %88 = vadd.xlane.f32.xlu1 %v87_v27 }
  0x2d   :  { %85 = vadd.xlane.f32.xlu0 %v84_v28 }
  0x3d   :  { %105 = vbcast.lane.b32.xlu1 %v103_v33, 256 }
  0x41   :  { %112 = vbcast.lane.b32.xlu1 %v110_v37, 256 }
  0x43   :  { %98 = vbcast.lane.b32.xlu0 %v96_v39, 256 }
  0x45   :  { %119 = vbcast.lane.b32.xlu1 %v117_v41, 256 }
  0x47   :  { %126 = vbcast.lane.b32.xlu0 %v124_v43, 256 }
  0x49   :  { %133 = vbcast.lane.b32.xlu1 %v131_v45, 256 }
  0x4b   :  { %140 = vbcast.lane.b32.xlu0 %v138_v47, 256 }
  0x4d   :  { %147 = vbcast.lane.b32.xlu1 %v145_v48, 256 }
  0xa9   :  { %v74_v49 = vpop.xlane.xlu1 %73 }
  0xaa   :  { %v68_v50 = vpop.xlane.xlu0 %67 }
  0xad   :  { %v77_v51 = vpop.xlane.xlu1 %76 }
  0xae   :  { %v71_v52 = vpop.xlane.xlu0 %70 }
  0xb1   :  { %v83_v53 = vpop.xlane.xlu1 %82 }
  0xb2   :  { %v80_v54 = vpop.xlane.xlu0 %79 }
  0xb5   :  { %v89_v55 = vpop.xlane.xlu1 %88 }
  0xb6   :  { %v86_v56 = vpop.xlane.xlu0 %85 }
  0xb9   :  { %v106_v57 = vpop.permute.xlu1 %105 }
  0xba   :  { %v99_v58 = vpop.permute.xlu0 %98  ;;  %v716_v59 = vadd.f32 %v106_v57, %v71_v52 }
  0xbb   :  { %v157_v60 = vadd.f32 %v99_v58, %v68_v50 }
  0xbc   :  { %177 = vperm.xlu1 %535, %v716_v59  }
  0xbd   :  { %174 = vperm.xlu0 %534, %v157_v60   ;;  %v113_v61 = vpop.permute.xlu1 %112 }
  0xbe   :  { %v127_v62 = vpop.permute.xlu0 %126  ;;  %v719_v63 = vadd.f32 %v113_v61, %v74_v49 }
  0xbf   :  { %v722_v2 = vadd.f32 %v127_v62, %v80_v54 }
  0xc0   :  { %180 = vperm.xlu1 %535, %v719_v63  }
  0xc1   :  { %v120_v0 = vpop.permute.xlu1 %119 }
  0xc2   :  { %v724_v5 = vadd.f32 %v120_v0, %v77_v51  ;;  %v141_v7 = vpop.permute.xlu0 %140 }
  0xc3   :  { %v728_v11 = vadd.f32 %v141_v7, %v86_v56 }
  0xc4   :  { %183 = vperm.xlu0 %534, %v724_v5   ;;  %186 = vperm.xlu1 %535, %v722_v2  }
  0xc5   :  { %v134_v8 = vpop.permute.xlu1 %133 }
  0xc6   :  { %v730_v12 = vadd.f32 %v134_v8, %v83_v53 }
  0xc8   :  { %189 = vperm.xlu0 %534, %v730_v12   ;;  %192 = vperm.xlu1 %535, %v728_v11  }
  0xc9   :  { %v148_v15 = vpop.permute.xlu1 %147 }
  0xca   :  { %v734_v16 = vadd.f32 %v148_v15, %v89_v55 }
  0xcc   :  { %195 = vperm.xlu0 %534, %v734_v16  }
 0x137   :  { %v178_v17 = vpop.permute.xlu1 %177 }
 0x138   :  { %v175_v18 = vpop.permute.xlu0 %174  ;;  %v206_v20 = vrot.slane %v178_v17, %v655_v3 }
 0x139   :  { %v202_v23 = vrot.slane %v175_v18, %v655_v3 }
 0x13b   :  { %v181_v19 = vpop.permute.xlu1 %180  ;;  %v232_v27 = vsel %vm231_vm1, %v206_v20, %v202_v23 }
 0x13c   :  { %v210_v24 = vrot.slane %v181_v19, %v655_v3 }
 0x13e   :  { %v234_v29 = vsel %vm233_vm2, %v210_v24, %v232_v27 }
 0x13f   :  { %v187_v25 = vpop.permute.xlu1 %186  ;;  %v184_v26 = vpop.permute.xlu0 %183 }
 0x140   :  { %v214_v28 = vrot.slane %v184_v26, %v655_v3  ;;  %v218_v30 = vrot.slane %v187_v25, %v655_v3 }
 0x142   :  { %v236_v31 = vsel %vm235_vm3, %v214_v28, %v234_v29 }
 0x143   :  { %v193_v33 = vpop.permute.xlu1 %192  ;;  %v190_v36 = vpop.permute.xlu0 %189  ;;  %v238_v41 = vsel %vm237_vm4, %v218_v30, %v236_v31 }
 0x144   :  { %v222_v37 = vrot.slane %v190_v36, %v655_v3  ;;  %v226_v39 = vrot.slane %v193_v33, %v655_v3 }
 0x146   :  { %v240_v43 = vsel %vm239_vm5, %v222_v37, %v238_v41 }
 0x147   :  { %v196_v45 = vpop.permute.xlu0 %195  ;;  %v242_v48 = vsel %vm241_vm6, %v226_v39, %v240_v43 }
 0x148   :  { %v230_v47 = vrot.slane %v196_v45, %v655_v3 }
 0x14a   :  { %v244_v49 = vsel %vm243_vm7, %v230_v47, %v242_v48 }
 0x14b   :  { %v247_v50 = vsel %vm246_vm8, %v244_v49, -inf }
 0x14c   :  { %248 = vmax.xlane.f32.xlu1 %v247_v50 }
 0x1d5   :  { %v249_v51 = vpop.xlane.xlu1 %248 }
 0x1d6   :  { %v254_v52 = vrot.slane %v249_v51, %v95_v35  ;;  %v258_v53 = vrot.slane %v249_v51, %v102_v32  ;;  %v262_v54 = vrot.slane %v249_v51, %v109_v34  ;;  %v266_v58 = vrot.slane %v249_v51, %v116_v38 }
 0x1d7   :  { %v270_v35 = vrot.slane %v249_v51, %v123_v40  ;;  %v274_v34 = vrot.slane %v249_v51, %v130_v42  ;;  %v278_v38 = vrot.slane %v249_v51, %v137_v44  ;;  %v282_v40 = vrot.slane %v249_v51, %v144_v46 }
 0x1d8   :  { %v291_v55 = vsub.f32 %v157_v60, %v254_v52  ;;  %v292_v56 = vsub.f32 %v716_v59, %v258_v53  ;;  %v293_v61 = vsub.f32 %v719_v63, %v262_v54  ;;  %v294_v0 = vsub.f32 %v724_v5, %v266_v58 }
 0x1d9   :  { %v295_v59 = vsub.f32 %v722_v2, %v270_v35  ;;  %v296_v63 = vsub.f32 %v730_v12, %v274_v34  ;;  %v297_v5 = vsub.f32 %v728_v11, %v278_v38  ;;  %v298_v2 = vsub.f32 %v734_v16, %v282_v40 }
 0x1da   :  { %v299_v57 = vmul.f32 1.442695, %v291_v55  ;;  %v301_v62 = vmul.f32 1.442695, %v292_v56  ;;  %v303_v32 = vmul.f32 1.442695, %v293_v61 }
 0x1db   :  { %v305_v60 = vmul.f32 1.442695, %v294_v0  ;;  %v307_v7 = vmul.f32 1.442695, %v295_v59  ;;  %v309_v42 = vmul.f32 1.442695, %v296_v63 }
 0x1dc   :  { %536 = vpow2.f32 %v299_v57  ;;  %v311_v17 = vmul.f32 1.442695, %v297_v5  ;;  %v313_v12 = vmul.f32 1.442695, %v298_v2 }
 0x1dd   :  { %538 = vpow2.f32 %v301_v62 }
 0x1de   :  { %540 = vpow2.f32 %v303_v32 }
 0x1df   :  { %542 = vpow2.f32 %v305_v60 }
 0x1e0   :  { %544 = vpow2.f32 %v307_v7 }
 0x1e1   :  { %546 = vpow2.f32 %v309_v42 }
 0x1e2   :  { %548 = vpow2.f32 %v311_v17 }
 0x1e3   :  { %550 = vpow2.f32 %v313_v12 }
 0x1e9   :  { %v537_v8 = vpop.eup %536 }
 0x1ea   :  { %324 = vperm.xlu0 %534, %v537_v8   ;;  %v539_v15 = vpop.eup %538 }
 0x1eb   :  { %v541_v44 = vpop.eup %540 }
 0x1ec   :  { %v543_v18 = vpop.eup %542 }
 0x1ed   :  { %v545_v19 = vpop.eup %544 }
 0x1ee   :  { %327 = vperm.xlu0 %534, %v539_v15   ;;  %v547_v1 = vpop.eup %546 }
 0x1ef   :  { %v549_v46 = vpop.eup %548 }
 0x1f0   :  { %v551_v11 = vpop.eup %550 }
 0x1f2   :  { %330 = vperm.xlu0 %534, %v541_v44  }
 0x1f6   :  { %333 = vperm.xlu0 %534, %v543_v18  }
 0x1fa   :  { %336 = vperm.xlu0 %534, %v545_v19  }
 0x1fe   :  { %339 = vperm.xlu0 %534, %v547_v1  }
 0x202   :  { %342 = vperm.xlu0 %534, %v549_v46  }
 0x206   :  { %345 = vperm.xlu0 %534, %v551_v11  }
 0x265   :  { %v325_v20 = vpop.permute.xlu0 %324 }
 0x266   :  { %v350_v29 = vrot.slane %v325_v20, %v655_v3  ;;  %v398_v53 = vmul.f32 %v325_v20, %v662_v6 }
 0x268   :  { %v406_v58 = vsel %vm65_vm0, %v398_v53, 0.0 }
 0x269   :  { %v328_v23 = vpop.permute.xlu0 %327  ;;  %v407_v0 = vrot.slane %v406_v58, 4 }
 0x26a   :  { %v354_v27 = vrot.slane %v328_v23, %v655_v3  ;;  %v399_v54 = vmul.f32 %v328_v23, %v668_v10 }
 0x26b   :  { %v408_v63 = vadd.f32 %v407_v0, %v406_v58 }
 0x26c   :  { %v379_v36 = vsel %vm231_vm1, %v354_v27, %v350_v29  ;;  %v413_v61 = vsel %vm65_vm0, %v399_v54, 0.0 }
 0x26d   :  { %v331_v16 = vpop.permute.xlu0 %330  ;;  %v409_v2 = vrot.slane %v408_v63, 2 }
 0x26e   :  { %v358_v28 = vrot.slane %v331_v16, %v655_v3  ;;  %v400_v55 = vmul.f32 %v331_v16, %v657_v4  ;;  %v414_v4 = vrot.slane %v413_v61, 4 }
 0x26f   :  { %v410_v11 = vadd.f32 %v409_v2, %v408_v63 }
 0x270   :  { %v380_v39 = vsel %vm233_vm2, %v358_v28, %v379_v36  ;;  %v420_v62 = vsel %vm65_vm0, %v400_v55, 0.0  ;;  %v415_v7 = vadd.f32 %v414_v4, %v413_v61 }
 0x271   :  { %v334_v24 = vpop.permute.xlu0 %333  ;;  %v421_v32 = vrot.slane %v420_v62, 4  ;;  %v411_v28 = vrot.slane %v410_v11, 1 }
 0x272   :  { %v362_v30 = vrot.slane %v334_v24, %v655_v3  ;;  %v401_v56 = vmul.f32 %v334_v24, %v666_v9  ;;  %v416_v17 = vrot.slane %v415_v7, 2 }
 0x273   :  { %v422_v8 = vadd.f32 %v421_v32, %v420_v62 }
 0x274   :  { %v381_v43 = vsel %vm235_vm3, %v362_v30, %v380_v39  ;;  %v427_v35 = vsel %vm65_vm0, %v401_v56, 0.0  ;;  %v417_v20 = vadd.f32 %v416_v17, %v415_v7 }
 0x275   :  { %v337_v25 = vpop.permute.xlu0 %336  ;;  %v423_v44 = vrot.slane %v422_v8, 2 }
 0x276   :  { %v366_v31 = vrot.slane %v337_v25, %v655_v3  ;;  %v402_v57 = vmul.f32 %v337_v25, %v674_v14  ;;  %v418_v29 = vrot.slane %v417_v20, 1 }
 0x277   :  { %v424_v23 = vadd.f32 %v423_v44, %v422_v8 }
 0x278   :  { %v382_v45 = vsel %vm237_vm4, %v366_v31, %v381_v43  ;;  %v434_v9 = vsel %vm65_vm0, %v402_v57, 0.0  ;;  %v419_v43 = vadd.f32 %v418_v29, %v417_v20 }
 0x279   :  { %v340_v26 = vpop.permute.xlu0 %339  ;;  %v435_v60 = vrot.slane %v434_v9, 4  ;;  %v425_v30 = vrot.slane %v424_v23, 1 }
 0x27a   :  { %v370_v37 = vrot.slane %v340_v26, %v655_v3 }
 0x27b   :  { %v436_v5 = vadd.f32 %v435_v60, %v434_v9 }
 0x27c   :  { %v383_v49 = vsel %vm239_vm5, %v370_v37, %v382_v45 }
 0x27d   :  { %v343_v33 = vpop.permute.xlu0 %342  ;;  %v437_v1 = vrot.slane %v436_v5, 2 }
 0x27e   :  { %v374_v41 = vrot.slane %v343_v33, %v655_v3  ;;  %v404_v6 = vmul.f32 %v343_v33, %v684_v22 }
 0x280   :  { %v384_v50 = vsel %vm241_vm6, %v374_v41, %v383_v49  ;;  %v448_v34 = vsel %vm65_vm0, %v404_v6, 0.0  ;;  %v412_v41 = vadd.f32 %v411_v28, %v410_v11 }
 0x281   :  { %v346_v47 = vpop.permute.xlu0 %345  ;;  %v449_v40 = vrot.slane %v448_v34, 4 }
 0x282   :  { %v378_v48 = vrot.slane %v346_v47, %v655_v3  ;;  %v403_v3 = vmul.f32 %v340_v26, %v672_v13  ;;  %v405_v10 = vmul.f32 %v346_v47, %v682_v21  ;;  %v428_v13 = vrot.slane %v427_v35, 4 }
 0x283   :  { %v450_v18 = vadd.f32 %v449_v40, %v448_v34  ;;  %v438_v26 = vadd.f32 %v437_v1, %v436_v5  ;;  %v426_v47 = vadd.f32 %v425_v30, %v424_v23 }
 0x284   :  { %v385_v51 = vsel %vm243_vm7, %v378_v48, %v384_v50  ;;  %v441_v14 = vsel %vm65_vm0, %v403_v3, 0.0  ;;  %v455_v59 = vsel %vm65_vm0, %v405_v10, 0.0  ;;  %v429_v22 = vadd.f32 %v428_v13, %v427_v35 }
 0x285   :  { %v387_v52 = vsel %vm246_vm8, %v385_v51, 0.0  ;;  %v442_v38 = vrot.slane %v441_v14, 4  ;;  %v456_v21 = vrot.slane %v455_v59, 4  ;;  %v451_v24 = vrot.slane %v450_v18, 2 }
 0x286   :  { %388 = vadd.xlane.f32.xlu0 %v387_v52  ;;  %v430_v12 = vrot.slane %v429_v22, 2  ;;  %v439_v37 = vrot.slane %v438_v26, 1 }
 0x287   :  { %v443_v42 = vadd.f32 %v442_v38, %v441_v14  ;;  %v457_v19 = vadd.f32 %v456_v21, %v455_v59  ;;  %v452_v33 = vadd.f32 %v451_v24, %v450_v18 }
 0x288   :  { %v431_v16 = vadd.f32 %v430_v12, %v429_v22  ;;  %v440_v55 = vadd.f32 %v439_v37, %v438_v26 }
 0x289   :  { %v444_v46 = vrot.slane %v443_v42, 2  ;;  %v458_v25 = vrot.slane %v457_v19, 2  ;;  %v453_v49 = vrot.slane %v452_v33, 1 }
 0x28a   :  { %v432_v31 = vrot.slane %v431_v16, 1 }
 0x28b   :  { %v445_v27 = vadd.f32 %v444_v46, %v443_v42  ;;  %v459_v36 = vadd.f32 %v458_v25, %v457_v19  ;;  %v454_v6 = vadd.f32 %v453_v49, %v452_v33 }
 0x28c   :  { %v433_v48 = vadd.f32 %v432_v31, %v431_v16 }
 0x28d   :  { %v446_v39 = vrot.slane %v445_v27, 1  ;;  %v460_v50 = vrot.slane %v459_v36, 1 }
 0x28f   :  { %v447_v56 = vadd.f32 %v446_v39, %v445_v27  ;;  %v461_v10 = vadd.f32 %v460_v50, %v459_v36 }
 0x30f   :  { %v389_v15 = vpop.xlane.xlu0 %388 }
 0x310   :  { %552 = vrcp.f32 %v389_v15 }
 0x31d   :  { %v553_v45 = vpop.eup %552 }
 0x31e   :  { %v464_v51 = vrot.slane %v553_v45, 1  ;;  %v465_v52 = vrot.slane %v553_v45, 2  ;;  %v466_v53 = vrot.slane %v553_v45, 3  ;;  %v467_v54 = vrot.slane %v553_v45, 4 }
 0x31f   :  { %v468_v57 = vrot.slane %v553_v45, 5  ;;  %v469_v3 = vrot.slane %v553_v45, 6  ;;  %v470_v58 = vrot.slane %v553_v45, 7  ;;  %v479_v4 = vmul.f32 %v553_v45, %v412_v41 }
 0x320   :  { %v480_v61 = vmul.f32 %v464_v51, %v419_v43  ;;  %v481_v62 = vmul.f32 %v465_v52, %v426_v47  ;;  %v482_v35 = vmul.f32 %v466_v53, %v433_v48  ;;  %v483_v0 = vmul.f32 %v467_v54, %v440_v55 }
 0x321   :  { %v484_v9 = vmul.f32 %v468_v57, %v447_v56  ;;  %v485_v13 = vmul.f32 %v469_v3, %v454_v6  ;;  %v486_v34 = vmul.f32 %v470_v58, %v461_v10 }
 0x322   :  { %v495_v14 = vrot.slane %v480_v61, 7  ;;  %v497_v32 = vrot.slane %v481_v62, 6  ;;  %v499_v60 = vrot.slane %v482_v35, 5  ;;  %v501_v63 = vrot.slane %v483_v0, 4 }
 0x323   :  { %v503_v8 = vrot.slane %v484_v9, 3  ;;  %v505_v40 = vrot.slane %v485_v13, 2  ;;  %v507_v5 = vrot.slane %v486_v34, 1 }
 0x324   :  { %v496_v59 = vsel %vm231_vm1, %v495_v14, %v479_v4 }
 0x325   :  { %v498_v38 = vsel %vm233_vm2, %v497_v32, %v496_v59 }
 0x326   :  { %v500_v7 = vsel %vm235_vm3, %v499_v60, %v498_v38 }
 0x327   :  { %v502_v22 = vsel %vm237_vm4, %v501_v63, %v500_v7 }
 0x328   :  { %v504_v21 = vsel %vm239_vm5, %v503_v8, %v502_v22 }
 0x329   :  { %v506_v42 = vsel %vm241_vm6, %v505_v40, %v504_v21 }
 0x32a   :  { %v508_v15 = vsel %vm243_vm7, %v507_v5, %v506_v42 }
 0x32b   :  { %510 = vst.msk [vmem:[#allocation7] sm:$0xff] %vm65_vm0, %v508_v15 }
 0x32c   :  { %605 = shalt.err (!%p602_p0)
}
 0x32d   :  { %520 = dma.vmem_to_hbm [thread:$0]  %s518_s2, 128, %s822_s3, [#allocation4]  }
 0x32e   :  { %618 = dma.done.wait [#allocation4], 128  }
 0x32f   :  { %619 = vsyncadd [#allocation4], 4294967168 }
 0x330   :  { %524 = vsyncpa [#allocation3], 1 }
 0x331   :  { %525 = vsyncpa [#allocation6], 1 }
 0x332   :  { %526 = vsyncpa [#allocation4], 1 }

</bundles_post_ra>
